<compile_context>
chip_gen: v6e
topology: v6e:2x2x1
jax: 0.10.0
libtpu: 0.0.40
codegen_flags: <defaults>
</compile_context>

<pallas_src>
import functools

import jax
import jax.numpy as jnp
from jax.experimental import pallas as pl
from jax.experimental.pallas import tpu as pltpu

STATE_SIZE = 30       # len(range(1, 31))
ACTION_SIZE = 31      # len(range(-15, 16))
HIDDEN_SIZE = 64
IN_PAD = 32           # state features padded to 32 lanes only (tiny K pad)
PAD = 128             # lane-dense hidden / output width


def _round_up(x, m):
    return (x + m - 1) // m * m


def _choose_tiling(batch):
    """Pick (tm, b_pad) for the batch grid.

    * tail padding bounded by < 128 rows (never a whole large tile),
    * tm = largest of {512, 256, 128} dividing b_pad,
    * any batch > 128 gets >= 2 grid steps (v7x dual-TC sharding of the
      "parallel" axis).
    """
    if batch <= 128:
        tm = max(8, _round_up(batch, 8))
        return tm, tm                      # single small tile
    b_pad = _round_up(batch, 128)
    for tm in (512, 256, 128):
        if b_pad % tm == 0 and b_pad // tm >= 2:
            return tm, b_pad
    return 128, b_pad


def _mid_dtype_for_backend():
    """bf16 bias/ReLU epilogue on v6e/v7x (bf16 VALUs); f32 on v5e / unknown."""
    try:
        kind = jax.devices()[0].device_kind.lower()
    except Exception:
        return jnp.float32
    if "v6" in kind or "v7" in kind:
        return jnp.bfloat16
    return jnp.float32


def dqn_kernel(x_ref, w1_ref, b1_ref, w2_ref, b2_ref, w3_ref, b3_ref, o_ref,
               *, mid_dtype):
    # Fully fused 3-layer MLP on one (TM, 32)->(TM, 128) activation tile.
    x = x_ref[...]                                            # (TM, 32) bf16
    # fc1 + ReLU (epilogue in mid_dtype: bf16 on v6e/v7x, f32 on v5e).
    h1 = jnp.dot(x, w1_ref[...], preferred_element_type=mid_dtype)
    h1 = jnp.maximum(h1 + b1_ref[...].astype(mid_dtype), 0).astype(jnp.bfloat16)
    # fc2 + ReLU.
    h2 = jnp.dot(h1, w2_ref[...], preferred_element_type=mid_dtype)
    h2 = jnp.maximum(h2 + b2_ref[...].astype(mid_dtype), 0).astype(jnp.bfloat16)
    # fc3: always f32 MXU accumulation, then cast to the (bf16) output stream.
    out = jnp.dot(h2, w3_ref[...], preferred_element_type=jnp.float32)
    out = out + b3_ref[...]
    o_ref[...] = out.astype(o_ref.dtype)                      # (TM, 128)


def dqn_forward(x, padded_params, *, out_dtype=jnp.bfloat16):
    """x: (B, STATE_SIZE) float32.  padded_params: output of prepare_params()."""
    w1, b1, w2, b2, w3, b3 = padded_params
    batch = x.shape[0]
    tm, b_pad = _choose_tiling(batch)

    # Single small wrapper pad: batch -> b_pad rows, features 30 -> 32 lanes,
    # cast to bf16 once.  (64 B/row input stream instead of 256 B/row.)
    xp = jnp.zeros((b_pad, IN_PAD), jnp.bfloat16)
    xp = xp.at[:batch, :STATE_SIZE].set(x.astype(jnp.bfloat16))

    grid = (b_pad // tm,)
    x_spec = pl.BlockSpec((tm, IN_PAD), lambda i: (i, 0))
    o_spec = pl.BlockSpec((tm, PAD), lambda i: (i, 0))
    w1_spec = pl.BlockSpec((IN_PAD, PAD), lambda i: (0, 0))   # resident weights
    w_spec = pl.BlockSpec((PAD, PAD), lambda i: (0, 0))
    b_spec = pl.BlockSpec((1, PAD), lambda i: (0, 0))

    flops = 2 * b_pad * (IN_PAD * PAD + 2 * PAD * PAD)
    bytes_accessed = (b_pad * IN_PAD * 2                       # bf16 x in
                      + (IN_PAD * PAD + 2 * PAD * PAD) * 2     # bf16 weights
                      + 3 * PAD * 4                            # f32 biases
                      + b_pad * PAD * jnp.dtype(out_dtype).itemsize)

    kernel = functools.partial(dqn_kernel, mid_dtype=_mid_dtype_for_backend())
    out = pl.pallas_call(
        kernel,
        out_shape=jax.ShapeDtypeStruct((b_pad, PAD), out_dtype),
        grid=grid,
        in_specs=[x_spec, w1_spec, b_spec, w_spec, b_spec, w_spec, b_spec],
        out_specs=o_spec,
        compiler_params=pltpu.CompilerParams(
            dimension_semantics=("parallel",)),
        cost_estimate=pl.CostEstimate(
            flops=flops, transcendentals=0, bytes_accessed=bytes_accessed),
    )(xp, w1, b1, w2, b2, w3, b3)
    # Under jit this slice fuses with downstream consumers; callers that can
    # consume the padded (b_pad, 128) slab directly should do so.
    return out[:batch, :ACTION_SIZE]


def init_params(key):
    """Deterministic init mimicking nn.Linear's U(-1/sqrt(fan_in), 1/sqrt(fan_in)).

    Returns unpadded float32 params; weights stored as (in, out) == W_torch.T.
    """
    def linear(key, fan_in, fan_out):
        kw, kb = jax.random.split(key)
        bound = 1.0 / jnp.sqrt(fan_in)
        w = jax.random.uniform(kw, (fan_in, fan_out), jnp.float32, -bound, bound)
        b = jax.random.uniform(kb, (1, fan_out), jnp.float32, -bound, bound)
        return w, b

    k1, k2, k3 = jax.random.split(key, 3)
    w1, b1 = linear(k1, STATE_SIZE, HIDDEN_SIZE)
    w2, b2 = linear(k2, HIDDEN_SIZE, HIDDEN_SIZE)
    w3, b3 = linear(k3, HIDDEN_SIZE, ACTION_SIZE)
    return (w1, b1, w2, b2, w3, b3)


def prepare_params(params):
    """One-time (outside the kernel) padding + bf16 cast of weights.

    w1 pads its input dim only to 32 (matches the 32-lane x slab); all output /
    hidden dims pad to 128.  Padded rows/cols of W and padded lanes of b are
    zero, so the extra lanes carry exact zeros through ReLU and never
    contaminate real outputs.
    """
    w1, b1, w2, b2, w3, b3 = params

    def pad_w(w, rows, cols):
        wp = jnp.zeros((rows, cols), jnp.float32)
        wp = wp.at[:w.shape[0], :w.shape[1]].set(w)
        return wp.astype(jnp.bfloat16)

    def pad_b(b):
        bp = jnp.zeros((1, PAD), jnp.float32)
        return bp.at[:, :b.shape[1]].set(b)        # biases stay f32

    return (pad_w(w1, IN_PAD, PAD), pad_b(b1),
            pad_w(w2, PAD, PAD), pad_b(b2),
            pad_w(w3, PAD, PAD), pad_b(b3))


def dqn_reference(x, params):
    w1, b1, w2, b2, w3, b3 = params
    h1 = jnp.maximum(x @ w1 + b1, 0.0)
    h2 = jnp.maximum(h1 @ w2 + b2, 0.0)
    return h2 @ w3 + b3


if __name__ == "__main__":
    key = jax.random.PRNGKey(0)
    kx, kp = jax.random.split(key)

    params = init_params(kp)
    padded_params = prepare_params(params)

    fwd = jax.jit(dqn_forward)

    # Small demo batch (single-tile path).
    batch = 8
    x = jax.random.normal(kx, (batch, STATE_SIZE), jnp.float32)
    out = jax.block_until_ready(fwd(x, padded_params))
    ref = dqn_reference(x, params)
    assert out.shape == (batch, ACTION_SIZE)
    assert jnp.allclose(out.astype(jnp.float32), ref, atol=5e-2, rtol=5e-2), \
        float(jnp.max(jnp.abs(out.astype(jnp.float32) - ref)))

    # Gridded path: B=260 -> padded batch 384, tile 128, 3 grid steps
    # (tail waste bounded by <128 rows instead of a whole large tile).
    batch2 = 260
    x2 = jax.random.normal(kx, (batch2, STATE_SIZE), jnp.float32)
    out2 = jax.block_until_ready(fwd(x2, padded_params))
    ref2 = dqn_reference(x2, params)
    assert out2.shape == (batch2, ACTION_SIZE)
    assert jnp.allclose(out2.astype(jnp.float32), ref2, atol=5e-2, rtol=5e-2), \
        float(jnp.max(jnp.abs(out2.astype(jnp.float32) - ref2)))

    print("KERNEL_OK")
</pallas_src>

<mosaic_0001>
module attributes {stable_mosaic.version = 11 : i64} {
  func.func @dqn_kernel(%arg0: i32, %arg1: memref<8x32xbf16, #tpu.memory_space<vmem>>, %arg2: memref<32x128xbf16, #tpu.memory_space<vmem>>, %arg3: memref<1x128xf32, #tpu.memory_space<vmem>>, %arg4: memref<128x128xbf16, #tpu.memory_space<vmem>>, %arg5: memref<1x128xf32, #tpu.memory_space<vmem>>, %arg6: memref<128x128xbf16, #tpu.memory_space<vmem>>, %arg7: memref<1x128xf32, #tpu.memory_space<vmem>>, %arg8: memref<8x128xbf16, #tpu.memory_space<vmem>>) attributes {dimension_semantics = [#tpu.dimension_semantics<parallel>], iteration_bounds = array<i64: 1>, scalar_prefetch = 0 : i64, scratch_operands = 0 : i64, tpu.core_type = #tpu.core_type<tc>, window_params = [{transform_indices = @transform_0, window_bounds = array<i64: 8, 32>}, {pipeline_mode = #tpu.pipeline_mode<synchronous>, transform_indices = @transform_1, window_bounds = array<i64: 32, 128>}, {pipeline_mode = #tpu.pipeline_mode<synchronous>, transform_indices = @transform_2, window_bounds = array<i64: 1, 128>}, {pipeline_mode = #tpu.pipeline_mode<synchronous>, transform_indices = @transform_3, window_bounds = array<i64: 128, 128>}, {pipeline_mode = #tpu.pipeline_mode<synchronous>, transform_indices = @transform_4, window_bounds = array<i64: 1, 128>}, {pipeline_mode = #tpu.pipeline_mode<synchronous>, transform_indices = @transform_5, window_bounds = array<i64: 128, 128>}, {pipeline_mode = #tpu.pipeline_mode<synchronous>, transform_indices = @transform_6, window_bounds = array<i64: 1, 128>}, {transform_indices = @transform_7, window_bounds = array<i64: 8, 128>}]} {
    %c0 = arith.constant 0 : index
    %c0_0 = arith.constant 0 : index
    %0 = vector.load %arg1[%c0, %c0_0] : memref<8x32xbf16, #tpu.memory_space<vmem>>, vector<8x32xbf16>
    %c0_1 = arith.constant 0 : index
    %c0_2 = arith.constant 0 : index
    %1 = vector.load %arg2[%c0_1, %c0_2] : memref<32x128xbf16, #tpu.memory_space<vmem>>, vector<32x128xbf16>
    %cst = arith.constant dense<0.000000e+00> : vector<8x128xf32>
    %2 = tpu.matmul %0, %1, %cst {dimension_numbers = #tpu.dot_dimension_numbers<[1], [0], [0], [1], [0, 0, 1, 1], [], []>} : vector<8x32xbf16>, vector<32x128xbf16>, vector<8x128xf32> -> vector<8x128xf32>
    %c0_3 = arith.constant 0 : index
    %c0_4 = arith.constant 0 : index
    %3 = vector.load %arg3[%c0_3, %c0_4] : memref<1x128xf32, #tpu.memory_space<vmem>>, vector<1x128xf32>
    %4 = vector.broadcast %3 : vector<1x128xf32> to vector<8x128xf32>
    %5 = arith.addf %2, %4 : vector<8x128xf32>
    %cst_5 = arith.constant 0.000000e+00 : f32
    %6 = vector.broadcast %cst_5 : f32 to vector<8x128xf32>
    %7 = arith.maximumf %5, %6 : vector<8x128xf32>
    %8 = arith.truncf %7 : vector<8x128xf32> to vector<8x128xbf16>
    %c0_6 = arith.constant 0 : index
    %c0_7 = arith.constant 0 : index
    %9 = vector.load %arg4[%c0_6, %c0_7] : memref<128x128xbf16, #tpu.memory_space<vmem>>, vector<128x128xbf16>
    %cst_8 = arith.constant dense<0.000000e+00> : vector<8x128xf32>
    %10 = tpu.matmul %8, %9, %cst_8 {dimension_numbers = #tpu.dot_dimension_numbers<[1], [0], [0], [1], [0, 0, 1, 1], [], []>} : vector<8x128xbf16>, vector<128x128xbf16>, vector<8x128xf32> -> vector<8x128xf32>
    %c0_9 = arith.constant 0 : index
    %c0_10 = arith.constant 0 : index
    %11 = vector.load %arg5[%c0_9, %c0_10] : memref<1x128xf32, #tpu.memory_space<vmem>>, vector<1x128xf32>
    %12 = vector.broadcast %11 : vector<1x128xf32> to vector<8x128xf32>
    %13 = arith.addf %10, %12 : vector<8x128xf32>
    %cst_11 = arith.constant 0.000000e+00 : f32
    %14 = vector.broadcast %cst_11 : f32 to vector<8x128xf32>
    %15 = arith.maximumf %13, %14 : vector<8x128xf32>
    %16 = arith.truncf %15 : vector<8x128xf32> to vector<8x128xbf16>
    %c0_12 = arith.constant 0 : index
    %c0_13 = arith.constant 0 : index
    %17 = vector.load %arg6[%c0_12, %c0_13] : memref<128x128xbf16, #tpu.memory_space<vmem>>, vector<128x128xbf16>
    %cst_14 = arith.constant dense<0.000000e+00> : vector<8x128xf32>
    %18 = tpu.matmul %16, %17, %cst_14 {dimension_numbers = #tpu.dot_dimension_numbers<[1], [0], [0], [1], [0, 0, 1, 1], [], []>} : vector<8x128xbf16>, vector<128x128xbf16>, vector<8x128xf32> -> vector<8x128xf32>
    %c0_15 = arith.constant 0 : index
    %c0_16 = arith.constant 0 : index
    %19 = vector.load %arg7[%c0_15, %c0_16] : memref<1x128xf32, #tpu.memory_space<vmem>>, vector<1x128xf32>
    %20 = vector.broadcast %19 : vector<1x128xf32> to vector<8x128xf32>
    %21 = arith.addf %18, %20 : vector<8x128xf32>
    %22 = arith.truncf %21 : vector<8x128xf32> to vector<8x128xbf16>
    %c0_17 = arith.constant 0 : index
    %c0_18 = arith.constant 0 : index
    %23 = vector.load %arg8[%c0_17, %c0_18] : memref<8x128xbf16, #tpu.memory_space<vmem>>, vector<8x128xbf16>
    tpu.vector_store %arg8[%c0_17, %c0_18], %22 {strides = array<i32>} : memref<8x128xbf16, #tpu.memory_space<vmem>>, vector<8x128xbf16>,
    return
  }
  func.func @transform_0(%arg0: i32) -> (i32, i32) {
    %c0_i32 = arith.constant 0 : i32
    %c0_i32_0 = arith.constant 0 : i32
    return %arg0, %c0_i32 : i32, i32
  }
  func.func @transform_1(%arg0: i32) -> (i32, i32) {
    %c0_i32 = arith.constant 0 : i32
    %c0_i32_0 = arith.constant 0 : i32
    %c0_i32_1 = arith.constant 0 : i32
    return %c0_i32, %c0_i32_0 : i32, i32
  }
  func.func @transform_2(%arg0: i32) -> (i32, i32) {
    %c0_i32 = arith.constant 0 : i32
    %c0_i32_0 = arith.constant 0 : i32
    %c0_i32_1 = arith.constant 0 : i32
    return %c0_i32, %c0_i32_0 : i32, i32
  }
  func.func @transform_3(%arg0: i32) -> (i32, i32) {
    %c0_i32 = arith.constant 0 : i32
    %c0_i32_0 = arith.constant 0 : i32
    %c0_i32_1 = arith.constant 0 : i32
    return %c0_i32, %c0_i32_0 : i32, i32
  }
  func.func @transform_4(%arg0: i32) -> (i32, i32) {
    %c0_i32 = arith.constant 0 : i32
    %c0_i32_0 = arith.constant 0 : i32
    %c0_i32_1 = arith.constant 0 : i32
    return %c0_i32, %c0_i32_0 : i32, i32
  }
  func.func @transform_5(%arg0: i32) -> (i32, i32) {
    %c0_i32 = arith.constant 0 : i32
    %c0_i32_0 = arith.constant 0 : i32
    %c0_i32_1 = arith.constant 0 : i32
    return %c0_i32, %c0_i32_0 : i32, i32
  }
  func.func @transform_6(%arg0: i32) -> (i32, i32) {
    %c0_i32 = arith.constant 0 : i32
    %c0_i32_0 = arith.constant 0 : i32
    %c0_i32_1 = arith.constant 0 : i32
    return %c0_i32, %c0_i32_0 : i32, i32
  }
  func.func @transform_7(%arg0: i32) -> (i32, i32) {
    %c0_i32 = arith.constant 0 : i32
    %c0_i32_0 = arith.constant 0 : i32
    return %arg0, %c0_i32 : i32, i32
  }
}

</mosaic_0001>

<bundles_post_ra>
// kernel: dqn_forward.1
= control target key start
LH: loop header
LB: loop body
LE: loop exit
PB: predicated region body
PF: predicated region fallthrough
CT: control target
= control target key end

     0   :  { %12 = vsyncpa [#allocation3], 0  ;;  %s648_s0 = inlined_call_operand.vmem [shape: bf16[8,32], index: 0, kind: input, shape index: {}]   ;;  %s649_s1 = inlined_call_operand.vmem [shape: bf16[32,128], index: 1, kind: input, shape index: {}]   ;;  %s650_s2 = inlined_call_operand.vmem [shape: f32[1,128], index: 2, kind: input, shape index: {}]   ;;  %s651_s3 = inlined_call_operand.hbm [shape: bf16[128,128], index: 3, kind: input, shape index: {}]   ;;  %s652_s4 = inlined_call_operand.vmem [shape: f32[1,128], index: 4, kind: input, shape index: {}]   ;;  %s653_s5 = inlined_call_operand.hbm [shape: bf16[128,128], index: 5, kind: input, shape index: {}]   ;;  %s654_s6 = inlined_call_operand.vmem [shape: f32[1,128], index: 6, kind: input, shape index: {}]   ;;  %s655_s7 = inlined_call_operand.hbm [shape: bf16[8,128], index: 7, kind: output, shape index: {}]  }
   0x1   :  { %13 = vsyncpa [#allocation6], 0 }
   0x2   :  { %14 = vsyncpa [#allocation4], 0  ;;  %s550_s24 = smov [#allocation2]  }
   0x3   :  { %s26_s25 = sshll.u32 %s550_s24, 4  ;;  %s27_s25 = int_to_ptr.vmem [resolvable:$true] %s26_s25 }
   0x4   :  { %s492_s26 = scalar_lea.vmem %s27_s25, 1024  ;;  %p497_p1 = scmp.lt.s32.totalorder %s27_s25, %s27_s25 }
   0x5   :  { %p493_p0 = scmp.ne.s32.totalorder %s27_s25, %s492_s26  ;;  %p498_p2 = scmp.lt.s32.totalorder %s492_s26, %s492_s26 }
   0x7   :  { %p499_p3 = por %p498_p2, %p497_p1 }
   0x9   :  { %p500_p4 = pnand %p499_p3, %p493_p0 }
   0xb   :  { %503 = shalt.err (!%p500_p4)
}
   0xc   :  { %s551_s27 = smov 64   ;;  %s552_s28 = smov 4  }
   0xd   :  { %32 = dma.hbm_to_vmem [thread:$0]  %s651_s3, 1024, %s27_s25, [#allocation3], %s551_s27, %s551_s27, %s552_s28  }
   0xe   :  { %s553_s8 = smov [#allocation5]  }
   0xf   :  { %s40_s9 = sshll.u32 %s553_s8, 4  ;;  %s41_s9 = int_to_ptr.vmem [resolvable:$true] %s40_s9 }
  0x10   :  { %s512_s10 = scalar_lea.vmem %s41_s9, 1024  ;;  %p517_p6 = scmp.lt.s32.totalorder %s41_s9, %s41_s9 }
  0x11   :  { %p513_p5 = scmp.ne.s32.totalorder %s41_s9, %s512_s10  ;;  %p518_p7 = scmp.lt.s32.totalorder %s512_s10, %s512_s10 }
  0x13   :  { %p519_p8 = por %p518_p7, %p517_p6 }
  0x15   :  { %p520_p9 = pnand %p519_p8, %p513_p5 }
  0x17   :  { %523 = shalt.err (!%p520_p9)
}
  0x18   :  { %46 = dma.hbm_to_vmem [thread:$0]  %s653_s5, 1024, %s41_s9, [#allocation6], %s551_s27, %s551_s27, %s552_s28  }
  0x19   :  { %544 = dma.done.wait [#allocation3], 1024  }
  0x1a   :  { %545 = vsyncadd [#allocation3], 4294966272 }
  0x1b   :  { %546 = dma.done.wait [#allocation6], 1024  }
  0x1c   :  { %547 = vsyncadd [#allocation6], 4294966272  ;;  %v554_v0 = vmov 0.0   ;;  %vm555_vm0 = vmmov 0   ;;  %v466_v1 = vld [vmem:[%s649_s1 + $0x8] sm:$0xff]   ;;  %v467_v2 = vld [vmem:[%s649_s1] sm:$0xff]  }
  0x1d   :  { %411 = vmatprep.subr.bf16.mxu0 %v554_v0  ;;  %415 = vmatprep.mubr.msk.bf16.mxu0 %vm555_vm0, %v554_v0  ;;  %v468_v3 = vld [vmem:[#allocation2 + $0x38] sm:$0xff]   ;;  %vm80_vm1 = vcmask 261120   ;;  %v469_v4 = vld [vmem:[#allocation2 + $0x30] sm:$0xff]   ;;  %v56_v5 = vld [vmem:[%s648_s0] sm:$0xf]  ;;  %s556_s20 = smov [#allocation7]  }
  0x1e   :  { %419 = vmatprep.subr.bf16.mxu1 %v554_v0  ;;  %435 = vmatprep.mubr.msk.bf16.mxu1 %vm555_vm0, %v554_v0  ;;  %v470_v6 = vld [vmem:[#allocation2 + $0x28] sm:$0xff]   ;;  %v471_v7 = vld [vmem:[#allocation2 + $0x20] sm:$0xff]   ;;  %v472_v8 = vld [vmem:[#allocation2 + $0x18] sm:$0xff]   ;;  %s358_s21 = sshll.u32 %s556_s20, 4  ;;  %s359_s21 = int_to_ptr.vmem [resolvable:$true] %s358_s21 }
  0x1f   :  { %412 = vmatpush3.bf16.msra.mxu0 %v466_v1  ;;  %420 = vmatpush3.bf16.msra.mxu1 %v468_v3  ;;  %v473_v9 = vld [vmem:[#allocation2 + $0x10] sm:$0xff]   ;;  %v474_v10 = vld [vmem:[#allocation2 + $0x8] sm:$0xff]   ;;  %v475_v11 = vld [vmem:[#allocation2] sm:$0xff]   ;;  %p529_p11 = scmp.lt.s32.totalorder %s359_s21, %s359_s21 }
  0x20   :  { %413 = vmatprep.subr.bf16.mxu0 %v554_v0  ;;  %421 = vmatprep.subr.bf16.mxu1 %v554_v0  ;;  %v476_v12 = vld [vmem:[#allocation5 + $0x38] sm:$0xff]   ;;  %v477_v13 = vld [vmem:[#allocation5 + $0x30] sm:$0xff]   ;;  %v478_v14 = vld [vmem:[#allocation5 + $0x28] sm:$0xff]  }
  0x21   :  { %v479_v15 = vld [vmem:[#allocation5 + $0x20] sm:$0xff]   ;;  %v480_v16 = vld [vmem:[#allocation5 + $0x18] sm:$0xff]   ;;  %v481_v17 = vld [vmem:[#allocation5 + $0x10] sm:$0xff]  }
  0x22   :  { %v368_v18 = vld [vmem:[%s650_s2] ss:$0 sm:$0xff]  ;;  %v482_v26 = vld [vmem:[#allocation5 + $0x8] sm:$0xff]  }
  0x23   :  { %414 = vmatpush3.bf16.msra.mxu0 %v467_v2  ;;  %422 = vmatpush3.bf16.msra.mxu1 %v469_v4  ;;  %v483_v27 = vld [vmem:[#allocation5] sm:$0xff]  }
  0x24   :  { %439 = vmatprep.subr.bf16.mxu0 %v554_v0  ;;  %423 = vmatprep.subr.bf16.mxu1 %v554_v0  ;;  %v372_v28 = vld [vmem:[%s652_s4] ss:$0 sm:$0xff]  ;;  %s524_s4 = scalar_lea.vmem %s359_s21, 64 }
  0x25   :  { %v381_v36 = vld [vmem:[%s654_s6] ss:$0 sm:$0xff]  ;;  %p525_p10 = scmp.ne.s32.totalorder %s359_s21, %s524_s4  ;;  %p530_p12 = scmp.lt.s32.totalorder %s524_s4, %s524_s4 }
  0x26   :  { %416 = vmatmul.mubr.msk.bf16.vlgmr.msra.gmra.mxu0 %vm80_vm1, %v56_v5 }
  0x27   :  { %455 = vmatprep.mubr.msk.bf16.mxu0 %vm555_vm0, %v554_v0  ;;  %424 = vmatpush3.bf16.msra.mxu1 %v470_v6  ;;  %p531_p13 = por %p530_p12, %p529_p11 }
  0x28   :  { %425 = vmatprep.subr.bf16.mxu1 %v554_v0  ;;  %440 = vmatpush3.bf16.msra.mxu0 %v476_v12 }
  0x29   :  { %441 = vmatprep.subr.bf16.mxu0 %v554_v0  ;;  %p532_p0 = pnand %p531_p13, %p525_p10 }
  0x2b   :  { %426 = vmatpush3.bf16.msra.mxu1 %v471_v7 }
  0x2c   :  { %427 = vmatprep.subr.bf16.mxu1 %v554_v0  ;;  %442 = vmatpush3.bf16.msra.mxu0 %v477_v13 }
  0x2d   :  { %443 = vmatprep.subr.bf16.mxu0 %v554_v0 }
  0x2f   :  { %428 = vmatpush3.bf16.msra.mxu1 %v472_v8 }
  0x30   :  { %429 = vmatprep.subr.bf16.mxu1 %v554_v0  ;;  %444 = vmatpush3.bf16.msra.mxu0 %v478_v14 }
  0x31   :  { %445 = vmatprep.subr.bf16.mxu0 %v554_v0 }
  0x33   :  { %430 = vmatpush3.bf16.msra.mxu1 %v473_v9 }
  0x34   :  { %431 = vmatprep.subr.bf16.mxu1 %v554_v0  ;;  %446 = vmatpush3.bf16.msra.mxu0 %v479_v15 }
  0x35   :  { %447 = vmatprep.subr.bf16.mxu0 %v554_v0 }
  0x37   :  { %432 = vmatpush3.bf16.msra.mxu1 %v474_v10 }
  0x38   :  { %433 = vmatprep.subr.bf16.mxu1 %v554_v0  ;;  %448 = vmatpush3.bf16.msra.mxu0 %v480_v16 }
  0x39   :  { %449 = vmatprep.subr.bf16.mxu0 %v554_v0 }
  0x3b   :  { %434 = vmatpush3.bf16.msra.mxu1 %v475_v11 }
  0x3c   :  { %450 = vmatpush3.bf16.msra.mxu0 %v481_v17 }
  0x3d   :  { %451 = vmatprep.subr.bf16.mxu0 %v554_v0 }
  0x40   :  { %452 = vmatpush3.bf16.msra.mxu0 %v482_v26 }
  0x41   :  { %453 = vmatprep.subr.bf16.mxu0 %v554_v0 }
  0x44   :  { %454 = vmatpush3.bf16.msra.mxu0 %v483_v27 }
  0xe6   :  { %v118_v19 = vpop.f32.mrf.mxu0 }
  0xe7   :  { %v119_v20 = vadd.f32 %v368_v18, %v118_v19 }
  0xe8   :  { %v417_v21 = vpop.f32.mrf.mxu0 }
  0xe9   :  { %v124_v22 = vmax.f32 %v119_v20, 0.0 }
  0xea   :  { %v121_v23 = vpop.f32.mrf.mxu0 }
  0xeb   :  { %v125_v24 = vpack.c.bf16 %v124_v22, %v124_v22 }
  0xec   :  { %v418_v25 = vpop.f32.mrf.mxu0 }
  0xed   :  { %436 = vmatmul.mubr.bf16.vlgmr.msra.gmra.mxu1 %v125_v24 }
 0x1ad   :  { %v231_v29 = vpop.f32.mrf.mxu1 }
 0x1ae   :  { %v232_v30 = vadd.f32 %v372_v28, %v231_v29 }
 0x1af   :  { %v437_v31 = vpop.f32.mrf.mxu1 }
 0x1b0   :  { %v237_v32 = vmax.f32 %v232_v30, 0.0 }
 0x1b1   :  { %v234_v33 = vpop.f32.mrf.mxu1 }
 0x1b2   :  { %v238_v34 = vpack.c.bf16 %v237_v32, %v237_v32 }
 0x1b3   :  { %v438_v35 = vpop.f32.mrf.mxu1 }
 0x1b4   :  { %456 = vmatmul.mubr.bf16.vlgmr.msra.gmra.mxu0 %v238_v34 }
 0x274   :  { %v344_v37 = vpop.f32.mrf.mxu0 }
 0x275   :  { %v345_v38 = vadd.f32 %v381_v36, %v344_v37 }
 0x276   :  { %v457_v39 = vpop.f32.mrf.mxu0 }
 0x277   :  { %v350_v40 = vpack.c.bf16 %v345_v38, %v345_v38 }
 0x278   :  { %v347_v41 = vpop.f32.mrf.mxu0 }
 0x279   :  { %351 = vst [vmem:[#allocation7] sm:$0xf] %v350_v40 }
 0x27a   :  { %v458_v42 = vpop.f32.mrf.mxu0 }
 0x27b   :  { %535 = shalt.err (!%p532_p0)
}
 0x27c   :  { %361 = dma.vmem_to_hbm [thread:$0]  %s359_s21, 64, %s655_s7, [#allocation4]  }
 0x27d   :  { %548 = dma.done.wait [#allocation4], 64  }
 0x27e   :  { %549 = vsyncadd [#allocation4], 4294967232 }
 0x27f   :  { %365 = vsyncpa [#allocation3], 1 }
 0x280   :  { %366 = vsyncpa [#allocation6], 1 }
 0x281   :  { %367 = vsyncpa [#allocation4], 1 }

</bundles_post_ra>
